<compile_context>
chip_gen: v5e
topology: v5e:2x2
jax: 0.10.0
libtpu: 0.0.40
codegen_flags: <defaults>
</compile_context>

<pallas_src>
import math

import jax
import jax.numpy as jnp
from jax.experimental import pallas as pl
from jax.experimental.pallas import tpu as pltpu


_LANE = 128
_TARGET_TILE_BYTES = 4 << 20   # ~4 MiB per x/out tile buffer (v7x-safe: <=24 MiB total)


# ---------------------------------------------------------------------------
# Buffer construction — mirrors PositionalEncoding.__init__ exactly.
# ---------------------------------------------------------------------------
def make_pe_table(d_model: int, max_len: int = 500) -> jnp.ndarray:
    if d_model % 2 != 0:
        raise ValueError("PositionalEncoding requires an even d_model "
                         f"(got {d_model}), same as the classic PyTorch recipe.")
    position = jnp.arange(0, max_len, dtype=jnp.float32)[:, None]            # (max_len, 1)
    div = jnp.exp(jnp.arange(0, d_model, 2, dtype=jnp.float32)
                  * (-math.log(10000.0) / d_model))                          # (d_model/2,)
    pe = jnp.zeros((max_len, d_model), dtype=jnp.float32)
    pe = pe.at[:, 0::2].set(jnp.sin(position * div))
    pe = pe.at[:, 1::2].set(jnp.cos(position * div))
    return pe                                                                # (max_len, d_model)


# ---------------------------------------------------------------------------
# Kernel: lane-aligned VPU add. x/out blocks are (Tb, T, 128), pe block is
# (1, T, 128) — broadcast over the leading (batch) dim, no reshapes in-kernel.
# ---------------------------------------------------------------------------
def _pe_add_kernel(x_ref, pe_ref, o_ref):
    o_ref[...] = x_ref[...] + pe_ref[...]


def _round_up(x: int, m: int) -> int:
    return -(-x // m) * m


def _round_down(x: int, m: int) -> int:
    return (x // m) * m


def _pe_add(x_v: jnp.ndarray, pe_v: jnp.ndarray) -> jnp.ndarray:
    """x_v: (B, n_rows, 128); pe_v: (1, n_rows, 128), same dtype. Returns x_v + pe_v."""
    B, n_rows, lane = x_v.shape
    assert lane == _LANE and pe_v.shape == (1, n_rows, _LANE)
    itemsize = jnp.dtype(x_v.dtype).itemsize
    row_align = max(32 // itemsize, 8)            # 8 f32 / 16 bf16 / 32 int8-fp8
    max_rows = max(_TARGET_TILE_BYTES // (_LANE * itemsize), row_align)

    if n_rows <= max_rows:
        # Whole per-batch slab fits in one tile: block the batch axis so small
        # inputs don't become thousands of micro grid steps; pe block index is
        # constant -> fetched once and kept VMEM-resident.
        tile_rows = n_rows                        # full extent (no alignment needed)
        tile_b = max(1, min(B, max_rows // max(n_rows, 1)))
        grid = (1, pl.cdiv(B, tile_b))
    else:
        # Balanced row tiles (avoid a nearly-empty trailing block), batch innermost
        # so pe's block index (0, t, 0) is unchanged across the inner sweep.
        tile_b = 1
        n_tiles = pl.cdiv(n_rows, max_rows)
        tile_rows = _round_up(pl.cdiv(n_rows, n_tiles), row_align)
        tile_rows = max(min(tile_rows, _round_down(max_rows, row_align)), row_align)
        grid = (pl.cdiv(n_rows, tile_rows), B)

    blk_x = (tile_b, tile_rows, _LANE)
    blk_pe = (1, tile_rows, _LANE)

    # 3 arrays (x, out, pe), double-buffered by the pipeline; add headroom and
    # raise past v5e's 16 MiB scoped default while staying under v7x's 64 MiB.
    x_tile_bytes = tile_b * tile_rows * _LANE * itemsize
    pe_tile_bytes = tile_rows * _LANE * itemsize
    need = 2 * (2 * x_tile_bytes + pe_tile_bytes)
    vmem_limit = int(min(max(need + (8 << 20), 32 << 20), 56 << 20))

    return pl.pallas_call(
        _pe_add_kernel,
        out_shape=jax.ShapeDtypeStruct((B, n_rows, _LANE), x_v.dtype),
        grid_spec=pltpu.PrefetchScalarGridSpec(
            num_scalar_prefetch=0,
            grid=grid,
            in_specs=[
                pl.BlockSpec(blk_x, lambda t, b: (b, t, 0)),   # x tile
                pl.BlockSpec(blk_pe, lambda t, b: (0, t, 0)),  # pe tile (constant over b)
            ],
            out_specs=pl.BlockSpec(blk_x, lambda t, b: (b, t, 0)),
        ),
        compiler_params=pltpu.CompilerParams(
            dimension_semantics=("parallel", "parallel"),
            vmem_limit_bytes=vmem_limit,
        ),
    )(x_v, pe_v)


# ---------------------------------------------------------------------------
# Module wrapper: caches the prepared (sliced / cast / flattened / padded) pe
# per (L, dtype) so the hot path is reshape(x) -> pallas add -> reshape(out).
# ---------------------------------------------------------------------------
class PositionalEncoding:
    def __init__(self, d_model: int, max_len: int = 500):
        self.d_model = d_model
        self.max_len = max_len
        self.pe = make_pe_table(d_model, max_len)      # (max_len, d_model) f32 buffer
        self._pe_cache = {}                            # (L, dtype) -> (1, n_rows, 128)

    def _prepared_pe(self, L: int, dtype) -> jnp.ndarray:
        key = (L, jnp.dtype(dtype).name)
        hit = self._pe_cache.get(key)
        if hit is not None:
            return hit
        LD = L * self.d_model
        pad = (-LD) % _LANE
        # NOTE: pe is cast to x.dtype to halve HBM traffic for bf16 inputs; the
        # PyTorch module would promote bf16 x + f32 pe to f32 (tiny numeric diff).
        pe_flat = self.pe[:L].astype(dtype).reshape(1, LD)
        if pad:
            pe_flat = jnp.pad(pe_flat, ((0, 0), (0, pad)))
        pe_v = jax.block_until_ready(pe_flat.reshape(1, (LD + pad) // _LANE, _LANE))
        self._pe_cache[key] = pe_v
        return pe_v

    def __call__(self, x: jnp.ndarray) -> jnp.ndarray:
        B, L, D = x.shape
        if D != self.d_model:
            raise ValueError(f"expected last dim {self.d_model}, got {D}")
        if L > self.max_len:
            raise ValueError(f"sequence length {L} exceeds max_len {self.max_len}")

        LD = L * D
        pad = (-LD) % _LANE
        n_rows = (LD + pad) // _LANE
        pe_v = self._prepared_pe(L, x.dtype)

        if pad:
            # Lane-dense fallback: flatten each batch row, pad (<128 elems) to a
            # multiple of 128, run the dense kernel, slice the padding off.
            x_v = jnp.pad(x.reshape(B, LD), ((0, 0), (0, pad))).reshape(B, n_rows, _LANE)
        else:
            x_v = x.reshape(B, n_rows, _LANE)

        out = _pe_add(x_v, pe_v)

        if pad:
            return out.reshape(B, n_rows * _LANE)[:, :LD].reshape(B, L, D)
        return out.reshape(B, L, D)


if __name__ == "__main__":
    MAX_LEN = 500

    # --- primary (lane-dense fast path): batch=2, seq=8, d_model=32 ---------
    B, L, D = 2, 8, 32
    key = jax.random.PRNGKey(0)
    x = jax.random.normal(key, (B, L, D), dtype=jnp.float32)
    module = PositionalEncoding(D, MAX_LEN)

    out = jax.block_until_ready(module(x))
    ref = x + module.pe[:L][None, :, :]
    assert out.shape == (B, L, D)
    assert jnp.allclose(out, ref, atol=1e-6), "mismatch vs reference (fast path)"

    # --- ragged path (L*D not a multiple of 128): d_model=40 ----------------
    B2, L2, D2 = 2, 8, 40
    x2 = jax.random.normal(jax.random.PRNGKey(1), (B2, L2, D2), dtype=jnp.float32)
    module2 = PositionalEncoding(D2, MAX_LEN)
    out2 = jax.block_until_ready(module2(x2))
    ref2 = x2 + module2.pe[:L2][None, :, :]
    assert out2.shape == (B2, L2, D2)
    assert jnp.allclose(out2, ref2, atol=1e-6), "mismatch vs reference (ragged path)"

    print("KERNEL_OK")
</pallas_src>

<mosaic_0001>
module attributes {stable_mosaic.version = 11 : i64} {
  func.func @_pe_add_kernel(%arg0: i32, %arg1: i32, %arg2: memref<2x2x128xf32, #tpu.memory_space<vmem>>, %arg3: memref<1x2x128xf32, #tpu.memory_space<vmem>>, %arg4: memref<2x2x128xf32, #tpu.memory_space<vmem>>) attributes {dimension_semantics = [#tpu.dimension_semantics<parallel>, #tpu.dimension_semantics<parallel>], iteration_bounds = array<i64: 1, 1>, scalar_prefetch = 0 : i64, scratch_operands = 0 : i64, tpu.core_type = #tpu.core_type<tc>, window_params = [{transform_indices = @transform_0, window_bounds = array<i64: 2, 2, 128>}, {transform_indices = @transform_1, window_bounds = array<i64: 1, 2, 128>}, {transform_indices = @transform_2, window_bounds = array<i64: 2, 2, 128>}]} {
    %c0 = arith.constant 0 : index
    %c0_0 = arith.constant 0 : index
    %c0_1 = arith.constant 0 : index
    %0 = vector.load %arg2[%c0, %c0_0, %c0_1] : memref<2x2x128xf32, #tpu.memory_space<vmem>>, vector<2x2x128xf32>
    %c0_2 = arith.constant 0 : index
    %c0_3 = arith.constant 0 : index
    %c0_4 = arith.constant 0 : index
    %1 = vector.load %arg3[%c0_2, %c0_3, %c0_4] : memref<1x2x128xf32, #tpu.memory_space<vmem>>, vector<1x2x128xf32>
    %2 = vector.broadcast %1 : vector<1x2x128xf32> to vector<2x2x128xf32>
    %3 = arith.addf %0, %2 : vector<2x2x128xf32>
    %c0_5 = arith.constant 0 : index
    %c0_6 = arith.constant 0 : index
    %c0_7 = arith.constant 0 : index
    %4 = vector.load %arg4[%c0_5, %c0_6, %c0_7] : memref<2x2x128xf32, #tpu.memory_space<vmem>>, vector<2x2x128xf32>
    tpu.vector_store %arg4[%c0_5, %c0_6, %c0_7], %3 {strides = array<i32>} : memref<2x2x128xf32, #tpu.memory_space<vmem>>, vector<2x2x128xf32>,
    return
  }
  func.func @transform_0(%arg0: i32, %arg1: i32) -> (i32, i32, i32) {
    %c0_i32 = arith.constant 0 : i32
    %c0_i32_0 = arith.constant 0 : i32
    return %arg1, %arg0, %c0_i32 : i32, i32, i32
  }
  func.func @transform_1(%arg0: i32, %arg1: i32) -> (i32, i32, i32) {
    %c0_i32 = arith.constant 0 : i32
    %c0_i32_0 = arith.constant 0 : i32
    %c0_i32_1 = arith.constant 0 : i32
    return %c0_i32, %arg0, %c0_i32_0 : i32, i32, i32
  }
  func.func @transform_2(%arg0: i32, %arg1: i32) -> (i32, i32, i32) {
    %c0_i32 = arith.constant 0 : i32
    %c0_i32_0 = arith.constant 0 : i32
    return %arg1, %arg0, %c0_i32 : i32, i32, i32
  }
}

</mosaic_0001>

<bundles_post_ra>
// kernel: tpu_custom_call.1
= control target key start
LH: loop header
LB: loop body
LE: loop exit
PB: predicated region body
PF: predicated region fallthrough
CT: control target
= control target key end

     0   :  { %7 = vsyncpa [#allocation3], 0  ;;  %s181_s0 = inlined_call_operand.hbm [shape: f32[2,2,128], index: 0, kind: input, shape index: {}]   ;;  %s182_s1 = inlined_call_operand.hbm [shape: f32[1,2,128], index: 1, kind: input, shape index: {}]   ;;  %s183_s2 = inlined_call_operand.hbm [shape: f32[2,2,128], index: 2, kind: output, shape index: {}]  }
   0x1   :  { %8 = vsyncpa [#allocation6], 0 }
   0x2   :  { %9 = vsyncpa [#allocation4], 0  ;;  %s14_s11 = sshll.u32 %s181_s0, 4  ;;  %s152_s12 = smov [#allocation2]   ;;  %s15_s11 = int_to_ptr.hbm [resolvable:$true] %s14_s11 }
   0x3   :  { %s16_s13 = sshll.u32 %s152_s12, 4  ;;  %s28_s16 = sshll.u32 %s182_s1, 4  ;;  %s17_s13 = int_to_ptr.vmem [resolvable:$true] %s16_s13  ;;  %s29_s16 = int_to_ptr.hbm [resolvable:$true] %s28_s16 }
   0x4   :  { %s153_s17 = smov 32   ;;  %s154_s18 = smov 2  }
   0x5   :  { %22 = dma.hbm_to_vmem [thread:$0]  %s15_s11, 64, %s17_s13, [#allocation3], %s153_s17, %s153_s17, %s154_s18  }
   0x6   :  { %s155_s19 = smov [#allocation5]  }
   0x7   :  { %s30_s20 = sshll.u32 %s155_s19, 4  ;;  %s31_s20 = int_to_ptr.vmem [resolvable:$true] %s30_s20 }
   0x8   :  { %33 = dma.hbm_to_vmem [thread:$0]  %s29_s16, 32, %s31_s20, [#allocation6]  }
   0x9   :  { %146 = dma.done.wait [#allocation3], 64  }
   0xa   :  { %147 = vsyncadd [#allocation3], 4294967232 }
   0xb   :  { %148 = dma.done.wait [#allocation6], 32  }
   0xc   :  { %149 = vsyncadd [#allocation6], 4294967264  ;;  %s156_s0 = smov [#allocation7]   ;;  %s55_s24 = sshll.u32 %s183_s2, 4  ;;  %v42_v0 = vld [vmem:[#allocation2] sm:$0x3]  ;;  %s56_s24 = int_to_ptr.hbm [resolvable:$true] %s55_s24 }
   0xd   :  { %s53_s21 = sshll.u32 %s156_s0, 4  ;;  %v44_v1 = vld [vmem:[#allocation5] sm:$0x3]  ;;  %v43_v2 = vld [vmem:[#allocation2 + $0x2] sm:$0x3]  ;;  %s54_s21 = int_to_ptr.vmem [resolvable:$true] %s53_s21 }
   0xe   :  { %v45_v3 = vadd.f32 %v44_v1, %v42_v0  ;;  %v46_v4 = vadd.f32 %v44_v1, %v43_v2 }
  0x10   :  { %47 = vst [vmem:[#allocation7] sm:$0x3] %v45_v3 }
  0x11   :  { %48 = vst [vmem:[#allocation7 + $0x2] sm:$0x3] %v46_v4 }
  0x12   :  { %61 = dma.vmem_to_hbm [thread:$0]  %s54_s21, 64, %s56_s24, [#allocation4], %s153_s17, %s153_s17, %s154_s18  }
  0x13   :  { %150 = dma.done.wait [#allocation4], 64  }
  0x14   :  { %151 = vsyncadd [#allocation4], 4294967232 }
  0x15   :  { %66 = vsyncpa [#allocation3], 1 }
  0x16   :  { %67 = vsyncpa [#allocation6], 1 }
  0x17   :  { %68 = vsyncpa [#allocation4], 1 }

</bundles_post_ra>
